<compile_context>
chip_gen: v5e
topology: v5e:2x2
jax: 0.10.0
libtpu: 0.0.40
codegen_flags: <defaults>
</compile_context>

<pallas_src>
import functools

import jax
import jax.numpy as jnp
from jax.experimental import pallas as pl
from jax.experimental.pallas import tpu as pltpu


def _block_mask_from_uniforms(u_pad, gamma, *, block_size, h, w):
    """1 - (bs x bs max-dilation) of the Bernoulli(gamma) sample.

    u_pad: (h+bs-1, w+bs-1, lanes) padded uniforms; the zero border of the
    mask is encoded as uniform value 2.0 (> any gamma) so the compare is 0.
    """
    bs = block_size
    bern = (u_pad < gamma).astype(jnp.float32)            # (Hp, Wp, lanes)
    rowmax = bern[0:h, :, :]
    for dd in range(1, bs):
        rowmax = jnp.maximum(rowmax, bern[dd:dd + h, :, :])
    dil = rowmax[:, 0:w, :]
    for ee in range(1, bs):
        dil = jnp.maximum(dil, rowmax[:, ee:ee + w, :])
    return jnp.float32(1.0) - dil                          # (h, w, lanes)


def _count_kernel(gamma_ref, u_ref, cnt_ref, *, block_size, h, w):
    bm = _block_mask_from_uniforms(u_ref[...], gamma_ref[0],
                                   block_size=block_size, h=h, w=w)

    # Global survivor count: same resident output block for every grid step.
    @pl.when(pl.program_id(0) == 0)
    def _():
        cnt_ref[...] = jnp.zeros_like(cnt_ref)

    cnt_ref[...] += jnp.sum(bm)


def _apply_kernel(params_ref, u_ref, x_ref, o_ref, *, block_size, h, w):
    gamma = params_ref[0]
    scale = params_ref[1]
    bm = _block_mask_from_uniforms(u_ref[...], gamma,
                                   block_size=block_size, h=h, w=w)
    o_ref[...] = (bm * x_ref[...].astype(jnp.float32) * scale
                  ).astype(o_ref.dtype)


def _lane_tile(bc, per_lane_bytes, vmem_budget):
    """Largest multiple of 128 dividing bc whose per-step footprint fits."""
    if bc % 128 != 0:
        return bc                      # full extent is always a legal block dim
    cap = max(128, (vmem_budget // max(per_lane_bytes, 1)) // 128 * 128)
    t = min(bc, cap)
    while bc % t != 0:
        t -= 128
    return t


def dropblock(x, gamma, key, *, block_size=3, training=True):
    """DropBlock forward.  x: (B, C, H, W) NCHW, like the PyTorch module."""
    if not training:
        return x

    B, C, H, W = x.shape
    bs = block_size
    BC = B * C
    Hm, Wm = H - (bs - 1), W - (bs - 1)
    Hp, Wp = H + bs - 1, W + bs - 1
    x_bytes = jnp.dtype(x.dtype).itemsize

    # Lane-dense relayout: (H, W, B*C).
    x_t = jnp.transpose(x, (2, 3, 0, 1)).reshape(H, W, BC)

    # Uniforms for the Bernoulli sample, already embedded in the zero-padded
    # slab at offset (bs-1, bs-1); border = 2.0 so (u < gamma) is 0 there.
    u = jax.random.uniform(key, (Hm, Wm, BC), dtype=jnp.float32)
    u_pad = jnp.pad(u, ((bs - 1, bs - 1), (bs - 1, bs - 1), (0, 0)),
                    constant_values=2.0)

    gamma_f = jnp.float32(gamma)
    gamma_arr = jnp.reshape(gamma_f, (1,))

    # ---- Pass 1: global survivor count (no mask written to HBM). ----------
    per_lane1 = 2 * (Hp * Wp * 4)                      # double-buffered u tile
    tbc1 = _lane_tile(BC, per_lane1, 8 << 20)
    cnt = pl.pallas_call(
        functools.partial(_count_kernel, block_size=bs, h=H, w=W),
        out_shape=jax.ShapeDtypeStruct((1, 128), jnp.float32),
        grid=(BC // tbc1,),
        in_specs=[
            pl.BlockSpec(memory_space=pltpu.MemorySpace.SMEM),    # gamma
            pl.BlockSpec((Hp, Wp, tbc1), lambda i: (0, 0, i)),    # u_pad
        ],
        out_specs=pl.BlockSpec((1, 128), lambda i: (0, 0)),       # resident acc
        compiler_params=pltpu.CompilerParams(
            dimension_semantics=("arbitrary",)),   # count block is revisited
    )(gamma_arr, u_pad)

    count_m = jnp.float32(B * C * H * W)
    count_ones = cnt[0, 0]
    # Guard against the all-dropped degenerate case (would give inf/NaN).
    scale = count_m / jnp.maximum(count_ones, jnp.float32(1.0))
    params = jnp.stack([gamma_f, scale])               # [gamma, scale] in SMEM

    # ---- Pass 2: recompute mask per tile, rescale + apply. -----------------
    per_lane2 = 2 * (Hp * Wp * 4 + 2 * H * W * x_bytes)
    tbc2 = _lane_tile(BC, per_lane2, 10 << 20)
    out_t = pl.pallas_call(
        functools.partial(_apply_kernel, block_size=bs, h=H, w=W),
        out_shape=jax.ShapeDtypeStruct((H, W, BC), x.dtype),
        grid=(BC // tbc2,),
        in_specs=[
            pl.BlockSpec(memory_space=pltpu.MemorySpace.SMEM),    # [gamma, scale]
            pl.BlockSpec((Hp, Wp, tbc2), lambda i: (0, 0, i)),    # u_pad
            pl.BlockSpec((H, W, tbc2), lambda i: (0, 0, i)),      # x
        ],
        out_specs=pl.BlockSpec((H, W, tbc2), lambda i: (0, 0, i)),
        compiler_params=pltpu.CompilerParams(
            dimension_semantics=("parallel",)),    # shards across TCs on v7x
    )(params, u_pad, x_t)

    return jnp.transpose(out_t.reshape(H, W, B, C), (2, 3, 0, 1))


def _dropblock_reference(x, gamma, key, *, block_size=3):
    """Pure-jnp reference with the identical sampling, for verification."""
    B, C, H, W = x.shape
    bs = block_size
    BC = B * C
    Hm, Wm = H - (bs - 1), W - (bs - 1)
    u = jax.random.uniform(key, (Hm, Wm, BC), dtype=jnp.float32)
    u_pad = jnp.pad(u, ((bs - 1, bs - 1), (bs - 1, bs - 1), (0, 0)),
                    constant_values=2.0)
    bern = (u_pad < jnp.float32(gamma)).astype(jnp.float32)
    rowmax = bern[0:H]
    for dd in range(1, bs):
        rowmax = jnp.maximum(rowmax, bern[dd:dd + H])
    dil = rowmax[:, 0:W]
    for ee in range(1, bs):
        dil = jnp.maximum(dil, rowmax[:, ee:ee + W])
    bm = jnp.float32(1.0) - dil
    scale = jnp.float32(B * C * H * W) / jnp.maximum(jnp.sum(bm),
                                                     jnp.float32(1.0))
    x_t = jnp.transpose(x, (2, 3, 0, 1)).reshape(H, W, BC)
    out_t = (bm * x_t.astype(jnp.float32) * scale).astype(x.dtype)
    return jnp.transpose(out_t.reshape(H, W, B, C), (2, 3, 0, 1))


if __name__ == "__main__":
    key = jax.random.PRNGKey(0)
    kx, kn = jax.random.split(key)

    B, C, H, W = 2, 4, 16, 16
    x = jax.random.normal(kx, (B, C, H, W), dtype=jnp.float32)
    gamma = 0.1
    block_size = 3

    out = dropblock(x, gamma, kn, block_size=block_size, training=True)
    out = jax.block_until_ready(out)

    assert out.shape == x.shape and out.dtype == x.dtype
    assert bool(jnp.all(jnp.isfinite(out)))

    # Matches the pure-JAX reference bit-for-bit (same uniforms, same math).
    ref = jax.block_until_ready(
        _dropblock_reference(x, gamma, kn, block_size=block_size))
    assert bool(jnp.allclose(out, ref, rtol=1e-5, atol=1e-5))

    # Eval mode is the identity.
    out_eval = jax.block_until_ready(
        dropblock(x, gamma, kn, block_size=block_size, training=False))
    assert bool(jnp.allclose(out_eval, x))

    print("KERNEL_OK")
</pallas_src>

<mosaic_0001>
module attributes {stable_mosaic.version = 11 : i64} {
  func.func @_count_kernel(%arg0: i32, %arg1: memref<1xf32, #tpu.memory_space<smem>>, %arg2: memref<18x18x8xf32, #tpu.memory_space<vmem>>, %arg3: memref<1x128xf32, #tpu.memory_space<vmem>>) attributes {dimension_semantics = [#tpu.dimension_semantics<arbitrary>], iteration_bounds = array<i64: 1>, scalar_prefetch = 0 : i64, scratch_operands = 0 : i64, tpu.core_type = #tpu.core_type<tc>, window_params = [{transform_indices = @transform_0, window_bounds = array<i64: 1>}, {transform_indices = @transform_1, window_bounds = array<i64: 18, 18, 8>}, {pipeline_mode = #tpu.pipeline_mode<synchronous>, transform_indices = @transform_2, window_bounds = array<i64: 1, 128>}]} {
    %c0 = arith.constant 0 : index
    %c0_0 = arith.constant 0 : index
    %c0_1 = arith.constant 0 : index
    %0 = vector.load %arg2[%c0, %c0_0, %c0_1] : memref<18x18x8xf32, #tpu.memory_space<vmem>>, vector<18x18x8xf32>
    %c0_2 = arith.constant 0 : index
    %1 = memref.load %arg1[%c0_2] : memref<1xf32, #tpu.memory_space<smem>>
    %2 = vector.broadcast %1 : f32 to vector<18x18x8xf32>
    %3 = arith.cmpf olt, %0, %2 : vector<18x18x8xf32>
    %4 = arith.extui %3 : vector<18x18x8xi1> to vector<18x18x8xi32>
    %5 = arith.sitofp %4 : vector<18x18x8xi32> to vector<18x18x8xf32>
    %6 = vector.extract_strided_slice %5 {offsets = [0, 0, 0], sizes = [16, 18, 8], strides = [1, 1, 1]} : vector<18x18x8xf32> to vector<16x18x8xf32>
    %7 = vector.extract_strided_slice %5 {offsets = [1, 0, 0], sizes = [16, 18, 8], strides = [1, 1, 1]} : vector<18x18x8xf32> to vector<16x18x8xf32>
    %8 = arith.maximumf %6, %7 : vector<16x18x8xf32>
    %9 = vector.extract_strided_slice %5 {offsets = [2, 0, 0], sizes = [16, 18, 8], strides = [1, 1, 1]} : vector<18x18x8xf32> to vector<16x18x8xf32>
    %10 = arith.maximumf %8, %9 : vector<16x18x8xf32>
    %11 = vector.extract_strided_slice %10 {offsets = [0, 0, 0], sizes = [16, 16, 8], strides = [1, 1, 1]} : vector<16x18x8xf32> to vector<16x16x8xf32>
    %12 = vector.extract_strided_slice %10 {offsets = [0, 1, 0], sizes = [16, 16, 8], strides = [1, 1, 1]} : vector<16x18x8xf32> to vector<16x16x8xf32>
    %13 = arith.maximumf %11, %12 : vector<16x16x8xf32>
    %14 = vector.extract_strided_slice %10 {offsets = [0, 2, 0], sizes = [16, 16, 8], strides = [1, 1, 1]} : vector<16x18x8xf32> to vector<16x16x8xf32>
    %15 = arith.maximumf %13, %14 : vector<16x16x8xf32>
    %cst = arith.constant 1.000000e+00 : f32
    %16 = vector.broadcast %cst : f32 to vector<16x16x8xf32>
    %17 = arith.subf %16, %15 : vector<16x16x8xf32>
    %c0_i32 = arith.constant 0 : i32
    %18 = arith.cmpi eq, %arg0, %c0_i32 : i32
    %19 = arith.extui %18 : i1 to i32
    %c0_i32_3 = arith.constant 0 : i32
    %20 = arith.cmpi ne, %19, %c0_i32_3 : i32
    scf.if %20 {
      %cst_9 = arith.constant 0.000000e+00 : f32
      %29 = vector.broadcast %cst_9 : f32 to vector<1x128xf32>
      %c0_10 = arith.constant 0 : index
      %c0_11 = arith.constant 0 : index
      %30 = vector.load %arg3[%c0_10, %c0_11] : memref<1x128xf32, #tpu.memory_space<vmem>>, vector<1x128xf32>
      tpu.vector_store %arg3[%c0_10, %c0_11], %29 {strides = array<i32>} : memref<1x128xf32, #tpu.memory_space<vmem>>, vector<1x128xf32>,
    } else {
    }
    %c0_4 = arith.constant 0 : index
    %c0_5 = arith.constant 0 : index
    %21 = vector.load %arg3[%c0_4, %c0_5] : memref<1x128xf32, #tpu.memory_space<vmem>>, vector<1x128xf32>
    %22 = vector.shape_cast %17 : vector<16x16x8xf32> to vector<1x16x16x8xf32>
    %cst_6 = arith.constant dense<0.000000e+00> : vector<1xf32>
    %23 = vector.multi_reduction <add>, %22, %cst_6 [1, 2, 3] : vector<1x16x16x8xf32> to vector<1xf32>
    %24 = vector.shape_cast %23 : vector<1xf32> to vector<1x1x1x1xf32>
    %25 = vector.extract %24[0, 0, 0, 0] : f32 from vector<1x1x1x1xf32>
    %26 = vector.broadcast %25 : f32 to vector<1x128xf32>
    %27 = arith.addf %21, %26 : vector<1x128xf32>
    %c0_7 = arith.constant 0 : index
    %c0_8 = arith.constant 0 : index
    %28 = vector.load %arg3[%c0_7, %c0_8] : memref<1x128xf32, #tpu.memory_space<vmem>>, vector<1x128xf32>
    tpu.vector_store %arg3[%c0_7, %c0_8], %27 {strides = array<i32>} : memref<1x128xf32, #tpu.memory_space<vmem>>, vector<1x128xf32>,
    return
  }
  func.func @transform_0(%arg0: i32) -> i32 {
    %c0_i32 = arith.constant 0 : i32
    %c0_i32_0 = arith.constant 0 : i32
    return %c0_i32 : i32
  }
  func.func @transform_1(%arg0: i32) -> (i32, i32, i32) {
    %c0_i32 = arith.constant 0 : i32
    %c0_i32_0 = arith.constant 0 : i32
    %c0_i32_1 = arith.constant 0 : i32
    return %c0_i32, %c0_i32_0, %arg0 : i32, i32, i32
  }
  func.func @transform_2(%arg0: i32) -> (i32, i32) {
    %c0_i32 = arith.constant 0 : i32
    %c0_i32_0 = arith.constant 0 : i32
    %c0_i32_1 = arith.constant 0 : i32
    return %c0_i32, %c0_i32_0 : i32, i32
  }
}

</mosaic_0001>

<bundles_post_ra>
// kernel: tpu_custom_call.1
= control target key start
LH: loop header
LB: loop body
LE: loop exit
PB: predicated region body
PF: predicated region fallthrough
CT: control target
= control target key end

     0   :  { %8 = vsyncpa [#allocation4], 0  ;;  %v879_v0 = vmov 0.0   ;;  %s2107_s0 = inlined_call_operand.<no memory space> [shape: f32[1], index: 0, kind: input, shape index: {}]   ;;  %s2108_s1 = inlined_call_operand.vmem [shape: f32[18,18,8], index: 1, kind: input, shape index: {}]   ;;  %s2109_s2 = inlined_call_operand.hbm [shape: f32[1,128], index: 2, kind: output, shape index: {}]  }
   0x1   :  { %701 = vst [vmem:[#allocation3] sm:$0x1] %v879_v0  ;;  %v13_v1 = vld [vmem:[%s2108_s1] sm:$0xff]  ;;  %v903_v2 = vstv %s2107_s0  ;;  %v14_v3 = vld [vmem:[%s2108_s1 + $0x8] sm:$0xff]  ;;  %v15_v4 = vld [vmem:[%s2108_s1 + $0x10] sm:$0x3] }
   0x2   :  { %v16_v5 = vld [vmem:[%s2108_s1 + $0x18] sm:$0xff]  ;;  %v17_v6 = vld [vmem:[%s2108_s1 + $0x20] sm:$0xff]  ;;  %v18_v7 = vld [vmem:[%s2108_s1 + $0x28] sm:$0x3]  ;;  %vm69_vm0 = vcmp.lt.f32.partialorder %v13_v1, %v903_v2  ;;  %vm70_vm1 = vcmp.lt.f32.partialorder %v14_v3, %v903_v2  ;;  %vm71_vm2 = vcmp.lt.f32.partialorder %v15_v4, %v903_v2  ;;  %s786_s6 = sshll.u32 %s2109_s2, 4  ;;  %s787_s6 = int_to_ptr.hbm [resolvable:$true] %s786_s6 }
   0x3   :  { %v19_v8 = vld [vmem:[%s2108_s1 + $0x30] sm:$0xff]  ;;  %v20_v9 = vld [vmem:[%s2108_s1 + $0x38] sm:$0xff]  ;;  %v929_v10 = vld [vmem:[%s2108_s1 + $0x40] sm:$0x3]  ;;  %vm72_vm3 = vcmp.lt.f32.partialorder %v16_v5, %v903_v2  ;;  %vm73_vm4 = vcmp.lt.f32.partialorder %v17_v6, %v903_v2  ;;  %v982_v20 = vsel %vm69_vm0, 1.0, %v879_v0  ;;  %vm74_vm5 = vcmp.lt.f32.partialorder %v18_v7, %v903_v2 }
   0x4   :  { %v935_v11 = vld [vmem:[%s2108_s1 + $0x48] sm:$0xff]  ;;  %v940_v12 = vld [vmem:[%s2108_s1 + $0x50] sm:$0xff]  ;;  %v945_v13 = vld [vmem:[%s2108_s1 + $0x58] sm:$0x3]  ;;  %vm75_vm6 = vcmp.lt.f32.partialorder %v19_v8, %v903_v2  ;;  %vm76_vm7 = vcmp.lt.f32.partialorder %v20_v9, %v903_v2  ;;  %v1005_v24 = vsel %vm70_vm1, 1.0, %v879_v0  ;;  %vm77_vm8 = vcmp.lt.f32.partialorder %v929_v10, %v903_v2 }
   0x5   :  { %v951_v14 = vld [vmem:[%s2108_s1 + $0x60] sm:$0xff]  ;;  %v956_v15 = vld [vmem:[%s2108_s1 + $0x68] sm:$0xff]  ;;  %v961_v16 = vld [vmem:[%s2108_s1 + $0x70] sm:$0x3]  ;;  %vm78_vm9 = vcmp.lt.f32.partialorder %v935_v11, %v903_v2  ;;  %vm79_vm10 = vcmp.lt.f32.partialorder %v940_v12, %v903_v2  ;;  %v1031_v28 = vsel %vm71_vm2, 1.0, %v879_v0  ;;  %vm80_vm11 = vcmp.lt.f32.partialorder %v945_v13, %v903_v2 }
   0x6   :  { %v967_v17 = vld [vmem:[%s2108_s1 + $0x78] sm:$0xff]  ;;  %v972_v18 = vld [vmem:[%s2108_s1 + $0x80] sm:$0xff]  ;;  %v977_v19 = vld [vmem:[%s2108_s1 + $0x88] sm:$0x3]  ;;  %vm81_vm12 = vcmp.lt.f32.partialorder %v951_v14, %v903_v2  ;;  %vm82_vm13 = vcmp.lt.f32.partialorder %v956_v15, %v903_v2  ;;  %v1057_v32 = vsel %vm72_vm3, 1.0, %v879_v0  ;;  %vm83_vm14 = vcmp.lt.f32.partialorder %v961_v16, %v903_v2 }
   0x7   :  { %v987_v21 = vld [vmem:[%s2108_s1 + $0x90] sm:$0xff]  ;;  %v992_v22 = vld [vmem:[%s2108_s1 + $0x98] sm:$0xff]  ;;  %v997_v23 = vld [vmem:[%s2108_s1 + $0xa0] sm:$0x3]  ;;  %vm84_vm15 = vcmp.lt.f32.partialorder %v967_v17, %v903_v2  ;;  %vm85_vm0 = vcmp.lt.f32.partialorder %v972_v18, %v903_v2  ;;  %v1083_v36 = vsel %vm73_vm4, 1.0, %v879_v0  ;;  %vm86_vm1 = vcmp.lt.f32.partialorder %v977_v19, %v903_v2 }
   0x8   :  { %v1010_v25 = vld [vmem:[%s2108_s1 + $0xa8] sm:$0xff]  ;;  %v1015_v26 = vld [vmem:[%s2108_s1 + $0xb0] sm:$0xff]  ;;  %v1020_v27 = vld [vmem:[%s2108_s1 + $0xb8] sm:$0x3]  ;;  %v1111_v40 = vsel %vm74_vm5, 1.0, %v879_v0  ;;  %v1139_v44 = vsel %vm75_vm6, 1.0, %v879_v0 }
   0x9   :  { %v1036_v29 = vld [vmem:[%s2108_s1 + $0xc0] sm:$0xff]  ;;  %v1041_v30 = vld [vmem:[%s2108_s1 + $0xc8] sm:$0xff]  ;;  %v1046_v31 = vld [vmem:[%s2108_s1 + $0xd0] sm:$0x3]  ;;  %vm90_vm4 = vcmp.lt.f32.partialorder %v1010_v25, %v903_v2  ;;  %vm91_vm5 = vcmp.lt.f32.partialorder %v1015_v26, %v903_v2  ;;  %v1144_v45 = vsel %vm76_vm7, 1.0, %v879_v0  ;;  %v1173_v49 = vsel %vm77_vm8, 1.0, %v879_v0 }
   0xa   :  { %v1062_v33 = vld [vmem:[%s2108_s1 + $0xd8] sm:$0xff]  ;;  %v1067_v34 = vld [vmem:[%s2108_s1 + $0xe0] sm:$0xff]  ;;  %v1072_v35 = vld [vmem:[%s2108_s1 + $0xe8] sm:$0x3]  ;;  %vm94_vm6 = vcmp.lt.f32.partialorder %v1041_v30, %v903_v2  ;;  %v1202_v53 = vsel %vm78_vm9, 1.0, %v879_v0  ;;  %v1229_v57 = vsel %vm79_vm10, 1.0, %v879_v0 }
   0xb   :  { %v1088_v37 = vld [vmem:[%s2108_s1 + $0xf0] sm:$0xff]  ;;  %v1093_v38 = vld [vmem:[%s2108_s1 + $0xf8] sm:$0xff]  ;;  %v1098_v39 = vld [vmem:[%s2108_s1 + $0x100] sm:$0x3]  ;;  %vm98_vm3 = vcmp.lt.f32.partialorder %v1072_v35, %v903_v2  ;;  %v1250_v61 = vsel %vm80_vm11, 1.0, %v879_v0  ;;  %v1271_v3 = vsel %vm81_vm12, 1.0, %v879_v0 }
   0xc   :  { %v1116_v41 = vld [vmem:[%s2108_s1 + $0x108] sm:$0xff]  ;;  %v1121_v42 = vld [vmem:[%s2108_s1 + $0x110] sm:$0xff]  ;;  %v1126_v43 = vld [vmem:[%s2108_s1 + $0x118] sm:$0x3]  ;;  %vm99_vm8 = vcmp.lt.f32.partialorder %v1088_v37, %v903_v2  ;;  %2181 = vst [vmem:[#allocation6_spill] sm:$0xff] %v1271_v3  ;;  %v1292_v7 = vsel %vm82_vm13, 1.0, %v879_v0 }
   0xd   :  { %v1149_v46 = vld [vmem:[%s2108_s1 + $0x120] sm:$0xff]  ;;  %v1154_v47 = vld [vmem:[%s2108_s1 + $0x128] sm:$0xff]  ;;  %v1159_v48 = vld [vmem:[%s2108_s1 + $0x130] sm:$0x3]  ;;  %2182 = vst [vmem:[#allocation7_spill] sm:$0xff] %v1292_v7  ;;  %v1301_v8 = vsel %vm83_vm14, 1.0, %v879_v0  ;;  %vm2187_vm14 = vcmp.lt.f32.partialorder %v987_v21, %v903_v2 }
   0xe   :  { %v1178_v50 = vld [vmem:[%s2108_s1 + $0x138] sm:$0xff]  ;;  %v1183_v51 = vld [vmem:[%s2108_s1 + $0x140] sm:$0xff]  ;;  %v1188_v52 = vld [vmem:[%s2108_s1 + $0x148] sm:$0x3]  ;;  %2183 = vst [vmem:[#allocation8_spill] sm:$0xff] %v1301_v8  ;;  %v1310_v9 = vsel %vm84_vm15, 1.0, %v879_v0  ;;  %vm2189_vm15 = vcmp.lt.f32.partialorder %v992_v22, %v903_v2 }
   0xf   :  { %v1207_v54 = vld [vmem:[%s2108_s1 + $0x150] sm:$0xff]  ;;  %v1212_v55 = vld [vmem:[%s2108_s1 + $0x158] sm:$0xff]  ;;  %v1217_v56 = vld [vmem:[%s2108_s1 + $0x160] sm:$0x3]  ;;  %2184 = vst [vmem:[#allocation9_spill] sm:$0xff] %v1310_v9  ;;  %v1319_v10 = vsel %vm85_vm0, 1.0, %v879_v0  ;;  %vm2191_vm0 = vcmp.lt.f32.partialorder %v997_v23, %v903_v2 }
  0x10   :  { %v58_v58 = vld [vmem:[%s2108_s1 + $0x168] sm:$0xff]  ;;  %v59_v59 = vld [vmem:[%s2108_s1 + $0x170] sm:$0xff]  ;;  %v60_v60 = vld [vmem:[%s2108_s1 + $0x178] sm:$0x3]  ;;  %2185 = vst [vmem:[#allocation10_spill] sm:$0xff] %v1319_v10  ;;  %v1325_v11 = vsel %vm86_vm1, 1.0, %v879_v0  ;;  %vm2195_vm1 = vcmp.lt.f32.partialorder %v1020_v27, %v903_v2 }
  0x11   :  { %v61_v62 = vld [vmem:[%s2108_s1 + $0x180] sm:$0xff]  ;;  %v62_v63 = vld [vmem:[%s2108_s1 + $0x188] sm:$0xff]  ;;  %v63_v1 = vld [vmem:[%s2108_s1 + $0x190] sm:$0x3]  ;;  %vm114_vm10 = vcmp.lt.f32.partialorder %v58_v58, %v903_v2  ;;  %2186 = vst [vmem:[#allocation11_spill] sm:$0xff] %v1325_v11  ;;  %v1331_v12 = vsel %vm2187_vm14, 1.0, %v879_v0  ;;  %vm2197_vm14 = vcmp.lt.f32.partialorder %v1036_v29, %v903_v2 }
  0x12   :  { %v64_v4 = vld [vmem:[%s2108_s1 + $0x198] sm:$0xff]  ;;  %v65_v5 = vld [vmem:[%s2108_s1 + $0x1a0] sm:$0xff]  ;;  %v66_v6 = vld [vmem:[%s2108_s1 + $0x1a8] sm:$0x3]  ;;  %vm117_vm12 = vcmp.lt.f32.partialorder %v61_v62, %v903_v2  ;;  %vm118_vm9 = vcmp.lt.f32.partialorder %v62_v63, %v903_v2  ;;  %vm119_vm11 = vcmp.lt.f32.partialorder %v63_v1, %v903_v2  ;;  %2188 = vst [vmem:[#allocation12_spill] sm:$0xff] %v1331_v12  ;;  %v1337_v13 = vsel %vm2189_vm15, 1.0, %v879_v0 }
  0x13   :  { %vm120_vm13 = vcmp.lt.f32.partialorder %v64_v4, %v903_v2  ;;  %vm121_vm7 = vcmp.lt.f32.partialorder %v65_v5, %v903_v2  ;;  %vm122_vm2 = vcmp.lt.f32.partialorder %v66_v6, %v903_v2  ;;  %2190 = vst [vmem:[#allocation13_spill] sm:$0xff] %v1337_v13  ;;  %v1343_v14 = vsel %vm2191_vm0, 1.0, %v879_v0  ;;  %s880_s1 = smov [#allocation3]  }
  0x14   :  { %2192 = vst [vmem:[#allocation14_spill] sm:$0xff] %v1343_v14  ;;  %v1349_v15 = vsel %vm90_vm4, 1.0, %v879_v0  ;;  %v1355_v16 = vsel %vm91_vm5, 1.0, %v879_v0  ;;  %v1361_v17 = vsel %vm2195_vm1, 1.0, %v879_v0  ;;  %v1367_v18 = vsel %vm2197_vm14, 1.0, %v879_v0  ;;  %s784_s3 = sshll.u32 %s880_s1, 4  ;;  %s785_s3 = int_to_ptr.vmem [resolvable:$true] %s784_s3 }
  0x15   :  { %2193 = vst [vmem:[#allocation15_spill] sm:$0xff] %v1349_v15  ;;  %v1373_v19 = vsel %vm94_vm6, 1.0, %v879_v0  ;;  %vm2200_vm4 = vcmp.lt.f32.partialorder %v1046_v31, %v903_v2  ;;  %vm2202_vm5 = vcmp.lt.f32.partialorder %v1062_v33, %v903_v2  ;;  %vm2204_vm15 = vcmp.lt.f32.partialorder %v1067_v34, %v903_v2 }
  0x16   :  { %2194 = vst [vmem:[#allocation16_spill] sm:$0xff] %v1355_v16  ;;  %v1379_v21 = vsel %vm2200_vm4, 1.0, %v879_v0  ;;  %v1385_v22 = vsel %vm2202_vm5, 1.0, %v879_v0  ;;  %v1391_v23 = vsel %vm2204_vm15, 1.0, %v879_v0  ;;  %v1397_v25 = vsel %vm98_vm3, 1.0, %v879_v0 }
  0x17   :  { %2196 = vst [vmem:[#allocation17_spill] sm:$0xff] %v1361_v17  ;;  %v1403_v26 = vsel %vm99_vm8, 1.0, %v879_v0  ;;  %vm2208_vm6 = vcmp.lt.f32.partialorder %v1093_v38, %v903_v2  ;;  %vm2210_vm0 = vcmp.lt.f32.partialorder %v1098_v39, %v903_v2  ;;  %vm2212_vm3 = vcmp.lt.f32.partialorder %v1116_v41, %v903_v2 }
  0x18   :  { %2198 = vst [vmem:[#allocation18_spill] sm:$0xff] %v1367_v18  ;;  %v1409_v27 = vsel %vm2208_vm6, 1.0, %v879_v0  ;;  %v1415_v29 = vsel %vm2210_vm0, 1.0, %v879_v0  ;;  %v1421_v30 = vsel %vm2212_vm3, 1.0, %v879_v0  ;;  %vm2214_vm8 = vcmp.lt.f32.partialorder %v1121_v42, %v903_v2 }
  0x19   :  { %2199 = vst [vmem:[#allocation19_spill] sm:$0xff] %v1373_v19  ;;  %v1427_v31 = vsel %vm2214_vm8, 1.0, %v879_v0  ;;  %vm2216_vm1 = vcmp.lt.f32.partialorder %v1126_v43, %v903_v2  ;;  %vm2218_vm14 = vcmp.lt.f32.partialorder %v1149_v46, %v903_v2  ;;  %vm2220_vm4 = vcmp.lt.f32.partialorder %v1154_v47, %v903_v2 }
  0x1a   :  { %2201 = vst [vmem:[#allocation20_spill] sm:$0xff] %v1379_v21  ;;  %v1433_v33 = vsel %vm2216_vm1, 1.0, %v879_v0  ;;  %v1439_v34 = vsel %vm2218_vm14, 1.0, %v879_v0  ;;  %v1445_v35 = vsel %vm2220_vm4, 1.0, %v879_v0  ;;  %vm2222_vm5 = vcmp.lt.f32.partialorder %v1159_v48, %v903_v2 }
  0x1b   :  { %2203 = vst [vmem:[#allocation21_spill] sm:$0xff] %v1385_v22  ;;  %v1451_v37 = vsel %vm2222_vm5, 1.0, %v879_v0  ;;  %vm2224_vm15 = vcmp.lt.f32.partialorder %v1178_v50, %v903_v2  ;;  %vm2226_vm6 = vcmp.lt.f32.partialorder %v1183_v51, %v903_v2  ;;  %vm2228_vm0 = vcmp.lt.f32.partialorder %v1188_v52, %v903_v2 }
  0x1c   :  { %2205 = vst [vmem:[#allocation22_spill] sm:$0xff] %v1391_v23  ;;  %v1457_v38 = vsel %vm2224_vm15, 1.0, %v879_v0  ;;  %v1463_v39 = vsel %vm2226_vm6, 1.0, %v879_v0  ;;  %v1469_v41 = vsel %vm2228_vm0, 1.0, %v879_v0  ;;  %vm2230_vm3 = vcmp.lt.f32.partialorder %v1207_v54, %v903_v2 }
  0x1d   :  { %2206 = vst [vmem:[#allocation23_spill] sm:$0xff] %v1397_v25  ;;  %v1475_v42 = vsel %vm2230_vm3, 1.0, %v879_v0  ;;  %vm2232_vm8 = vcmp.lt.f32.partialorder %v1212_v55, %v903_v2  ;;  %vm2234_vm1 = vcmp.lt.f32.partialorder %v1217_v56, %v903_v2  ;;  %v1492_v47 = vsel %vm114_vm10, 1.0, %v879_v0 }
  0x1e   :  { %2207 = vst [vmem:[#allocation24_spill] sm:$0xff] %v1403_v26  ;;  %v1481_v43 = vsel %vm2232_vm8, 1.0, %v879_v0  ;;  %v1487_v46 = vsel %vm2234_vm1, 1.0, %v879_v0  ;;  %vm2236_vm14 = vcmp.lt.f32.partialorder %v59_v59, %v903_v2  ;;  %vm2238_vm4 = vcmp.lt.f32.partialorder %v60_v60, %v903_v2 }
  0x1f   :  { %2209 = vst [vmem:[#allocation25_spill] sm:$0xff] %v1409_v27  ;;  %v1497_v48 = vsel %vm2236_vm14, 1.0, %v879_v0  ;;  %v1502_v50 = vsel %vm2238_vm4, 1.0, %v879_v0  ;;  %v1507_v51 = vsel %vm117_vm12, 1.0, %v879_v0  ;;  %v1512_v52 = vsel %vm118_vm9, 1.0, %v879_v0 }
  0x20   :  { %2211 = vst [vmem:[#allocation26_spill] sm:$0xff] %v1415_v29  ;;  %v1517_v54 = vsel %vm119_vm11, 1.0, %v879_v0  ;;  %v1522_v55 = vsel %vm120_vm13, 1.0, %v879_v0  ;;  %v1527_v56 = vsel %vm121_vm7, 1.0, %v879_v0  ;;  %v1532_v58 = vsel %vm122_vm2, 1.0, %v879_v0 }
  0x21   :  { %2213 = vst [vmem:[#allocation27_spill] sm:$0xff] %v1421_v30  ;;  %v231_v59 = vmax.f32 %v982_v20, %v1057_v32  ;;  %v232_v60 = vmax.f32 %v1005_v24, %v1083_v36  ;;  %v233_v62 = vmax.f32 %v1031_v28, %v1111_v40  ;;  %v234_v63 = vmax.f32 %v1057_v32, %v1139_v44 }
  0x22   :  { %2215 = vst [vmem:[#allocation28_spill] sm:$0xff] %v1427_v31  ;;  %v235_v1 = vmax.f32 %v1083_v36, %v1144_v45  ;;  %v236_v2 = vmax.f32 %v1111_v40, %v1173_v49  ;;  %v237_v0 = vmax.f32 %v1139_v44, %v1202_v53  ;;  %v238_v20 = vmax.f32 %v1144_v45, %v1229_v57 }
  0x23   :  { %2217 = vst [vmem:[#allocation29_spill] sm:$0xff] %v1433_v33  ;;  %v239_v24 = vmax.f32 %v1173_v49, %v1250_v61  ;;  %v240_v28 = vmax.f32 %v1202_v53, %v1271_v3  ;;  %v241_v32 = vmax.f32 %v1229_v57, %v1292_v7  ;;  %v242_v36 = vmax.f32 %v1250_v61, %v1301_v8 }
  0x24   :  { %2219 = vst [vmem:[#allocation30_spill] sm:$0xff] %v1439_v34  ;;  %v243_v40 = vmax.f32 %v1271_v3, %v1310_v9  ;;  %v244_v4 = vmax.f32 %v1292_v7, %v1319_v10  ;;  %v245_v5 = vmax.f32 %v1301_v8, %v1325_v11  ;;  %v246_v6 = vmax.f32 %v1310_v9, %v1331_v12 }
  0x25   :  { %2221 = vst [vmem:[#allocation31_spill] sm:$0xff] %v1445_v35  ;;  %v250_v3 = vmax.f32 %v1337_v13, %v1355_v16  ;;  %v251_v7 = vmax.f32 %v1343_v14, %v1361_v17  ;;  %v252_v8 = vmax.f32 %v1349_v15, %v1367_v18  ;;  %v253_v9 = vmax.f32 %v1355_v16, %v1373_v19 }
  0x26   :  { %2223 = vst [vmem:[#allocation32_spill] sm:$0xff] %v1451_v37  ;;  %v260_v16 = vmax.f32 %v1397_v25, %v1415_v29  ;;  %vm375_vm2 = vcmask 1046528   ;;  %vm520_vm7 = vcmask 1045504   ;;  %vm703_vm9 = vcmask 64512  }
  0x27   :  { %2225 = vst [vmem:[#allocation33_spill] sm:$0xff] %v1457_v38 }
  0x28   :  { %2227 = vst [vmem:[#allocation34_spill] sm:$0xff] %v1463_v39 }
  0x29   :  { %2229 = vst [vmem:[#allocation35_spill] sm:$0xff] %v1469_v41 }
  0x2a   :  { %2231 = vst [vmem:[#allocation36_spill] sm:$0xff] %v1475_v42 }
  0x2b   :  { %2233 = vst [vmem:[#allocation37_spill] sm:$0xff] %v1481_v43 }
  0x2c   :  { %2235 = vst [vmem:[#allocation38_spill] sm:$0xff] %v1487_v46 }
  0x2d   :  { %2237 = vst [vmem:[#allocation39_spill] sm:$0xff] %v1497_v48 }
  0x2e   :  { %2239 = vst [vmem:[#allocation40_spill] sm:$0xff] %v1507_v51 }
  0x2f   :  { %2240 = vst [vmem:[#allocation41_spill] sm:$0xff] %v1512_v52 }
  0x30   :  { %2241 = vst [vmem:[#allocation42_spill] sm:$0xff] %v1517_v54 }
  0x31   :  { %2242 = vst [vmem:[#allocation43_spill] sm:$0xff] %v1522_v55  ;;  %v249_v55 = vmax.f32 %v1331_v12, %v1349_v15  ;;  %v256_v12 = vmax.f32 %v1373_v19, %v1391_v23  ;;  %v259_v15 = vmax.f32 %v1391_v23, %v1409_v27  ;;  %v263_v19 = vmax.f32 %v1415_v29, %v1433_v33 }
  0x32   :  { %2243 = vst [vmem:[#allocation44_spill] sm:$0xff] %v1527_v56  ;;  %v248_v56 = vmax.f32 %v1325_v11, %v1343_v14  ;;  %v255_v11 = vmax.f32 %v1367_v18, %v1385_v22  ;;  %v258_v14 = vmax.f32 %v1385_v22, %v1403_v26  ;;  %v262_v18 = vmax.f32 %v1409_v27, %v1427_v31 }
  0x33   :  { %2244 = vst [vmem:[#allocation45_spill] sm:$0xff] %v1532_v58  ;;  %v247_v58 = vmax.f32 %v1319_v10, %v1337_v13  ;;  %v254_v10 = vmax.f32 %v1361_v17, %v1379_v21  ;;  %v257_v13 = vmax.f32 %v1379_v21, %v1397_v25  ;;  %v261_v17 = vmax.f32 %v1403_v26, %v1421_v30 }
  0x34   :  { %v264_v21 = vmax.f32 %v1421_v30, %v1439_v34  ;;  %v265_v22 = vmax.f32 %v1427_v31, %v1445_v35  ;;  %v266_v23 = vmax.f32 %v1433_v33, %v1451_v37  ;;  %v267_v25 = vmax.f32 %v1439_v34, %v1457_v38 }
  0x35   :  { %v268_v26 = vmax.f32 %v1445_v35, %v1463_v39  ;;  %v269_v27 = vmax.f32 %v1451_v37, %v1469_v41  ;;  %v270_v29 = vmax.f32 %v1457_v38, %v1475_v42  ;;  %v271_v30 = vmax.f32 %v1463_v39, %v1481_v43 }
  0x36   :  { %v272_v31 = vmax.f32 %v1469_v41, %v1487_v46  ;;  %v273_v33 = vmax.f32 %v1475_v42, %v1492_v47  ;;  %v274_v34 = vmax.f32 %v1481_v43, %v1497_v48  ;;  %v275_v35 = vmax.f32 %v1487_v46, %v1502_v50 }
  0x37   :  { %v276_v37 = vmax.f32 %v1492_v47, %v1507_v51  ;;  %v277_v38 = vmax.f32 %v1497_v48, %v1512_v52  ;;  %v278_v39 = vmax.f32 %v1502_v50, %v1517_v54  ;;  %v1631_v41 = vmax.f32 %v231_v59, %v1139_v44  ;;  %v2245_v48 = vld [vmem:[#allocation6_spill] sm:$0xff]  ;;  %v2247_v44 = vld [vmem:[#allocation7_spill] sm:$0xff] }
  0x38   :  { %v1634_v42 = vmax.f32 %v232_v60, %v1144_v45  ;;  %v1637_v43 = vmax.f32 %v233_v62, %v1173_v49  ;;  %v1640_v46 = vmax.f32 %v234_v63, %v1202_v53  ;;  %v1643_v51 = vmax.f32 %v235_v1, %v1229_v57  ;;  %v2249_v45 = vld [vmem:[#allocation8_spill] sm:$0xff]  ;;  %v2251_v49 = vld [vmem:[#allocation9_spill] sm:$0xff]  ;;  %v2252_v53 = vld [vmem:[#allocation10_spill] sm:$0xff] }
  0x39   :  { %v1646_v52 = vmax.f32 %v236_v2, %v1250_v61  ;;  %v1649_v54 = vmax.f32 %v237_v0, %v2245_v48  ;;  %v1652_v59 = vmax.f32 %v238_v20, %v2247_v44  ;;  %v1655_v60 = vmax.f32 %v239_v24, %v2249_v45  ;;  %v2253_v57 = vld [vmem:[#allocation11_spill] sm:$0xff]  ;;  %v2254_v61 = vld [vmem:[#allocation12_spill] sm:$0xff]  ;;  %v2255_v48 = vld [vmem:[#allocation13_spill] sm:$0xff] }
  0x3a   :  { %v1658_v62 = vmax.f32 %v240_v28, %v2251_v49  ;;  %v1661_v63 = vmax.f32 %v241_v32, %v2252_v53  ;;  %v1664_v1 = vmax.f32 %v242_v36, %v2253_v57  ;;  %v1667_v2 = vmax.f32 %v243_v40, %v2254_v61  ;;  %v2256_v20 = vld [vmem:[#allocation14_spill] sm:$0xff]  ;;  %v2257_v24 = vld [vmem:[#allocation15_spill] sm:$0xff]  ;;  %v2258_v28 = vld [vmem:[#allocation16_spill] sm:$0xff] }
  0x3b   :  { %2246 = vst [vmem:[#allocation6_spill] sm:$0xff] %v1649_v54  ;;  %v1670_v0 = vmax.f32 %v244_v4, %v2255_v48  ;;  %v1673_v44 = vmax.f32 %v245_v5, %v2256_v20  ;;  %v1676_v45 = vmax.f32 %v246_v6, %v2257_v24  ;;  %v1679_v49 = vmax.f32 %v247_v58, %v2258_v28  ;;  %v2259_v32 = vld [vmem:[#allocation17_spill] sm:$0xff]  ;;  %v2260_v36 = vld [vmem:[#allocation18_spill] sm:$0xff]  ;;  %v2261_v40 = vld [vmem:[#allocation19_spill] sm:$0xff] }
  0x3c   :  { %2248 = vst [vmem:[#allocation7_spill] sm:$0xff] %v1652_v59  ;;  %v1682_v53 = vmax.f32 %v248_v56, %v2259_v32  ;;  %v1685_v57 = vmax.f32 %v249_v55, %v2260_v36  ;;  %v1688_v61 = vmax.f32 %v250_v3, %v2261_v40  ;;  %v2262_v4 = vld [vmem:[#allocation20_spill] sm:$0xff]  ;;  %v2263_v5 = vld [vmem:[#allocation21_spill] sm:$0xff]  ;;  %v2265_v6 = vld [vmem:[#allocation22_spill] sm:$0xff] }
  0x3d   :  { %2250 = vst [vmem:[#allocation8_spill] sm:$0xff] %v1655_v60  ;;  %v1691_v48 = vmax.f32 %v251_v7, %v2262_v4  ;;  %v1694_v20 = vmax.f32 %v252_v8, %v2263_v5  ;;  %v1697_v24 = vmax.f32 %v253_v9, %v2265_v6  ;;  %v2267_v58 = vld [vmem:[#allocation23_spill] sm:$0xff]  ;;  %v2269_v56 = vld [vmem:[#allocation24_spill] sm:$0xff]  ;;  %v2270_v55 = vld [vmem:[#allocation25_spill] sm:$0xff] }
  0x3e   :  { %v1700_v28 = vmax.f32 %v254_v10, %v2267_v58  ;;  %v1703_v32 = vmax.f32 %v255_v11, %v2269_v56  ;;  %v1706_v36 = vmax.f32 %v256_v12, %v2270_v55  ;;  %v2271_v3 = vld [vmem:[#allocation26_spill] sm:$0xff]  ;;  %v2273_v7 = vld [vmem:[#allocation27_spill] sm:$0xff]  ;;  %v2274_v8 = vld [vmem:[#allocation28_spill] sm:$0xff] }
  0x3f   :  { %2264 = vst [vmem:[#allocation9_spill] sm:$0xff] %v1694_v20  ;;  %v1709_v40 = vmax.f32 %v257_v13, %v2271_v3  ;;  %v1712_v4 = vmax.f32 %v258_v14, %v2273_v7  ;;  %v1715_v5 = vmax.f32 %v259_v15, %v2274_v8  ;;  %v2276_v9 = vld [vmem:[#allocation29_spill] sm:$0xff]  ;;  %v2278_v10 = vld [vmem:[#allocation30_spill] sm:$0xff]  ;;  %v2280_v11 = vld [vmem:[#allocation31_spill] sm:$0xff] }
  0x40   :  { %2266 = vst [vmem:[#allocation10_spill] sm:$0xff] %v1697_v24  ;;  %v1718_v6 = vmax.f32 %v260_v16, %v2276_v9  ;;  %v1721_v58 = vmax.f32 %v261_v17, %v2278_v10  ;;  %v1724_v56 = vmax.f32 %v262_v18, %v2280_v11  ;;  %v2282_v12 = vld [vmem:[#allocation32_spill] sm:$0xff]  ;;  %v2284_v13 = vld [vmem:[#allocation33_spill] sm:$0xff]  ;;  %v2286_v14 = vld [vmem:[#allocation34_spill] sm:$0xff] }
  0x41   :  { %2268 = vst [vmem:[#allocation11_spill] sm:$0xff] %v1700_v28  ;;  %v1727_v55 = vmax.f32 %v263_v19, %v2282_v12  ;;  %v1730_v3 = vmax.f32 %v264_v21, %v2284_v13  ;;  %v1733_v7 = vmax.f32 %v265_v22, %v2286_v14  ;;  %v2288_v15 = vld [vmem:[#allocation35_spill] sm:$0xff]  ;;  %v2290_v16 = vld [vmem:[#allocation36_spill] sm:$0xff]  ;;  %v2292_v17 = vld [vmem:[#allocation37_spill] sm:$0xff]  ;;  %v1748_v19 = vmax.f32 %v270_v29, %v1492_v47 }
  0x42   :  { %2272 = vst [vmem:[#allocation12_spill] sm:$0xff] %v1709_v40  ;;  %v1736_v8 = vmax.f32 %v266_v23, %v2288_v15  ;;  %v1739_v9 = vmax.f32 %v267_v25, %v2290_v16  ;;  %v1742_v10 = vmax.f32 %v268_v26, %v2292_v17  ;;  %v2294_v18 = vld [vmem:[#allocation38_spill] sm:$0xff]  ;;  %v376_v21 = vrot.slane %v1631_v41, 1  ;;  %v2297_v13 = vld [vmem:[#allocation39_spill] sm:$0xff]  ;;  %v2299_v16 = vld [vmem:[#allocation40_spill] sm:$0xff] }
  0x43   :  { %2275 = vst [vmem:[#allocation13_spill] sm:$0xff] %v1715_v5  ;;  %v1745_v11 = vmax.f32 %v269_v27, %v2294_v18  ;;  %v377_v22 = vrot.slane %v1634_v42, 1  ;;  %v379_v23 = vrot.slane %v1637_v43, 1  ;;  %v381_v12 = vrot.slane %v1640_v46, 1  ;;  %v2300_v18 = vld [vmem:[#allocation41_spill] sm:$0xff] }
  0x44   :  { %2277 = vst [vmem:[#allocation14_spill] sm:$0xff] %v1718_v6  ;;  %v382_v25 = vrot.slane %v1643_v51, 1  ;;  %v384_v26 = vrot.slane %v1646_v52, 1  ;;  %v1757_v14 = vmax.f32 %v271_v30, %v2297_v13  ;;  %v386_v27 = vrot.slane %v1649_v54, 1  ;;  %v2303_v30 = vld [vmem:[#allocation43_spill] sm:$0xff] }
  0x45   :  { %2279 = vst [vmem:[#allocation15_spill] sm:$0xff] %v1721_v58  ;;  %v387_v29 = vrot.slane %v1652_v59, 1  ;;  %v389_v47 = vrot.slane %v1655_v60, 1  ;;  %v1763_v15 = vmax.f32 %v272_v31, %v1502_v50  ;;  %v1766_v17 = vmax.f32 %v273_v33, %v2299_v16  ;;  %v2307_v59 = vld [vmem:[#allocation45_spill] sm:$0xff] }
  0x46   :  { %2281 = vst [vmem:[#allocation16_spill] sm:$0xff] %v1724_v56  ;;  %v1775_v13 = vmax.f32 %v276_v37, %v2303_v30  ;;  %v1781_v60 = vmax.f32 %v278_v39, %v2307_v59  ;;  %v1784_v31 = vsel %vm375_vm2, %v376_v21, %v377_v22  ;;  %v1787_v33 = vsel %vm375_vm2, %v377_v22, %v379_v23 }
  0x47   :  { %2283 = vst [vmem:[#allocation17_spill] sm:$0xff] %v1727_v55  ;;  %v391_v37 = vrot.slane %v1658_v62, 1  ;;  %v1800_v39 = vsel %vm375_vm2, %v387_v29, %v389_v47  ;;  %v392_v50 = vrot.slane %v1661_v63, 1  ;;  %v394_v59 = vrot.slane %v1664_v1, 1 }
  0x48   :  { %2285 = vst [vmem:[#allocation18_spill] sm:$0xff] %v1730_v3  ;;  %v397_v21 = vrot.slane %v1670_v0, 1  ;;  %v399_v22 = vrot.slane %v1673_v44, 1  ;;  %v401_v23 = vrot.slane %v1676_v45, 1  ;;  %v412_v47 = vrot.slane %v1697_v24, 1 }
  0x49   :  { %2287 = vst [vmem:[#allocation19_spill] sm:$0xff] %v1733_v7  ;;  %v414_v16 = vrot.slane %v1700_v28, 1  ;;  %v1820_v30 = vsel %vm375_vm2, %v392_v50, %v394_v59  ;;  %v422_v24 = vrot.slane %v1715_v5, 1 }
  0x4a   :  { %2289 = vst [vmem:[#allocation20_spill] sm:$0xff] %v1736_v8  ;;  %v1831_v28 = vsel %vm375_vm2, %v397_v21, %v399_v22 }
  0x4b   :  { %2291 = vst [vmem:[#allocation21_spill] sm:$0xff] %v1739_v9  ;;  %v1849_v5 = vsel %vm375_vm2, %v412_v47, %v414_v16  ;;  %v526_v16 = vrot.slane %v1640_v46, 2 }
  0x4c   :  { %2293 = vst [vmem:[#allocation22_spill] sm:$0xff] %v1742_v10 }
  0x4d   :  { %2295 = vst [vmem:[#allocation23_spill] sm:$0xff] %v1745_v11  ;;  %v2301_v11 = vld [vmem:[#allocation42_spill] sm:$0xff] }
  0x4e   :  { %2296 = vst [vmem:[#allocation24_spill] sm:$0xff] %v1748_v19  ;;  %v1769_v19 = vmax.f32 %v274_v34, %v2300_v18  ;;  %v1772_v10 = vmax.f32 %v275_v35, %v2301_v11  ;;  %v1790_v34 = vsel %vm375_vm2, %v381_v12, %v382_v25  ;;  %v1793_v35 = vsel %vm375_vm2, %v382_v25, %v384_v26 }
  0x4f   :  { %2298 = vst [vmem:[#allocation25_spill] sm:$0xff] %v1757_v14  ;;  %v2305_v14 = vld [vmem:[#allocation44_spill] sm:$0xff]  ;;  %v396_v11 = vrot.slane %v1667_v2, 1  ;;  %v402_v12 = vrot.slane %v1679_v49, 1  ;;  %v404_v25 = vrot.slane %v1682_v53, 1  ;;  %v406_v26 = vrot.slane %v1685_v57, 1 }
  0x50   :  { %2302 = vst [vmem:[#allocation26_spill] sm:$0xff] %v1772_v10  ;;  %v1778_v54 = vmax.f32 %v277_v38, %v2305_v14  ;;  %v1797_v38 = vsel %vm375_vm2, %v386_v27, %v387_v29  ;;  %v407_v14 = vrot.slane %v1688_v61, 1  ;;  %v409_v27 = vrot.slane %v1691_v48, 1 }
  0x51   :  { %2304 = vst [vmem:[#allocation27_spill] sm:$0xff] %v1775_v13  ;;  %v411_v29 = vrot.slane %v1694_v20, 1  ;;  %v1817_v18 = vsel %vm375_vm2, %v391_v37, %v392_v50  ;;  %v1825_v13 = vsel %vm375_vm2, %v396_v11, %v397_v21  ;;  %v419_v10 = vrot.slane %v1709_v40, 1 }
  0x52   :  { %2306 = vst [vmem:[#allocation28_spill] sm:$0xff] %v1778_v54  ;;  %v417_v54 = vrot.slane %v1706_v36, 1  ;;  %v421_v20 = vrot.slane %v1712_v4, 1  ;;  %v1834_v37 = vsel %vm375_vm2, %v401_v23, %v402_v12  ;;  %v1837_v50 = vsel %vm375_vm2, %v402_v12, %v404_v25 }
  0x53   :  { %2308 = vst [vmem:[#allocation29_spill] sm:$0xff] %v1781_v60  ;;  %v416_v60 = vrot.slane %v1703_v32, 1  ;;  %v1840_v59 = vsel %vm375_vm2, %v406_v26, %v407_v14  ;;  %v1843_v11 = vsel %vm375_vm2, %v407_v14, %v409_v27  ;;  %v1846_v40 = vsel %vm375_vm2, %v411_v29, %v412_v47 }
  0x54   :  { %v424_v21 = vrot.slane %v1718_v6, 1  ;;  %v426_v23 = vrot.slane %v1721_v58, 1  ;;  %v427_v12 = vrot.slane %v1724_v56, 1  ;;  %v429_v25 = vrot.slane %v1727_v55, 1 }
  0x55   :  { %v1853_v22 = vsel %vm375_vm2, %v416_v60, %v417_v54  ;;  %v1859_v26 = vsel %vm375_vm2, %v417_v54, %v419_v10  ;;  %v1862_v14 = vsel %vm375_vm2, %v421_v20, %v422_v24  ;;  %v431_v27 = vrot.slane %v1730_v3, 1 }
  0x56   :  { %2309 = vst [vmem:[#allocation30_spill] sm:$0xff] %v1862_v14  ;;  %v521_v29 = vrot.slane %v1631_v41, 2  ;;  %v522_v47 = vrot.slane %v1634_v42, 2  ;;  %v524_v60 = vrot.slane %v1637_v43, 2  ;;  %v527_v56 = vrot.slane %v1643_v51, 2 }
  0x57   :  { %v1871_v55 = vsel %vm375_vm2, %v422_v24, %v424_v21  ;;  %v432_v54 = vrot.slane %v1733_v7, 1  ;;  %v434_v20 = vrot.slane %v1736_v8, 1  ;;  %v1876_v10 = vsel %vm375_vm2, %v426_v23, %v427_v12  ;;  %v2313_v8 = vld [vmem:[#allocation6_spill] sm:$0xff] }
  0x58   :  { %2310 = vst [vmem:[#allocation31_spill] sm:$0xff] %v1871_v55  ;;  %v1879_v3 = vsel %vm375_vm2, %v427_v12, %v429_v25  ;;  %v436_v43 = vrot.slane %v1739_v9, 1  ;;  %v529_v58 = vrot.slane %v1646_v52, 2  ;;  %v488_v14 = vmax.f32 %v1631_v41, %v1784_v31  ;;  %v2314_v9 = vld [vmem:[#allocation7_spill] sm:$0xff]  ;;  %v2316_v41 = vld [vmem:[#allocation22_spill] sm:$0xff] }
  0x59   :  { %2311 = vst [vmem:[#allocation32_spill] sm:$0xff] %v1876_v10  ;;  %v489_v24 = vmax.f32 %v1634_v42, %v1787_v33  ;;  %v490_v21 = vmax.f32 %v1640_v46, %v1790_v34  ;;  %v531_v7 = vrot.slane %v2313_v8, 2  ;;  %v523_v23 = vsel %vm520_vm7, %v521_v29, %v522_v47  ;;  %v2317_v10 = vld [vmem:[#allocation23_spill] sm:$0xff]  ;;  %v2318_v34 = vld [vmem:[#allocation8_spill] sm:$0xff] }
  0x5a   :  { %2312 = vst [vmem:[#allocation33_spill] sm:$0xff] %v1879_v3  ;;  %v525_v12 = vsel %vm520_vm7, %v522_v47, %v524_v60  ;;  %v528_v25 = vsel %vm520_vm7, %v526_v16, %v527_v56  ;;  %v532_v3 = vrot.slane %v2314_v9, 2  ;;  %v1895_v52 = vsel %vm375_vm2, %v431_v27, %v432_v54 }
  0x5b   :  { %2315 = vst [vmem:[#allocation34_spill] sm:$0xff] %v1895_v52  ;;  %v437_v31 = vrot.slane %v2316_v41, 1  ;;  %v439_v42 = vrot.slane %v2317_v10, 1  ;;  %v491_v46 = vmax.f32 %v1643_v51, %v1793_v35  ;;  %v530_v33 = vsel %vm520_vm7, %v527_v56, %v529_v58  ;;  %v2319_v10 = vld [vmem:[#allocation24_spill] sm:$0xff]  ;;  %v2320_v51 = vld [vmem:[#allocation25_spill] sm:$0xff] }
  0x5c   :  { %v534_v29 = vrot.slane %v2318_v34, 2  ;;  %v536_v47 = vrot.slane %v1658_v62, 2  ;;  %v537_v60 = vrot.slane %v1661_v63, 2  ;;  %v492_v16 = vmax.f32 %v2313_v8, %v1797_v38 }
  0x5d   :  { %v633_v27 = vmax.f32 %v488_v14, %v523_v23  ;;  %v634_v52 = vmax.f32 %v489_v24, %v525_v12  ;;  %v635_v55 = vmax.f32 %v490_v21, %v528_v25  ;;  %v1908_v41 = vsel %vm375_vm2, %v432_v54, %v434_v20 }
  0x5e   :  { %v441_v6 = vrot.slane %v2319_v10, 1  ;;  %v442_v35 = vrot.slane %v2320_v51, 1  ;;  %v533_v58 = vsel %vm520_vm7, %v531_v7, %v532_v3  ;;  %v1914_v56 = vsel %vm375_vm2, %v436_v43, %v437_v31 }
  0x5f   :  { %v1917_v34 = vsel %vm375_vm2, %v437_v31, %v439_v42  ;;  %v493_v8 = vmax.f32 %v2314_v9, %v1800_v39  ;;  %v636_v38 = vmax.f32 %v491_v46, %v530_v33  ;;  %v494_v14 = vmax.f32 %v1658_v62, %v1817_v18 }
  0x60   :  { %v535_v54 = vsel %vm520_vm7, %v532_v3, %v534_v29  ;;  %v538_v20 = vsel %vm520_vm7, %v536_v47, %v537_v60  ;;  %v539_v24 = vrot.slane %v1664_v1, 2  ;;  %v637_v7 = vmax.f32 %v492_v16, %v533_v58 }
  0x61   :  { %v665_v21 = vsub.f32 1.0, %v633_v27  ;;  %v666_v43 = vsub.f32 1.0, %v634_v52  ;;  %v667_v23 = vsub.f32 1.0, %v635_v55  ;;  %v444_v12 = vrot.slane %v1763_v15, 1 }
  0x62   :  { %v446_v25 = vrot.slane %v1766_v17, 1  ;;  %v541_v9 = vrot.slane %v1667_v2, 2  ;;  %v542_v39 = vrot.slane %v1670_v0, 2  ;;  %v495_v62 = vmax.f32 %v1661_v63, %v1820_v30 }
  0x63   :  { %v496_v3 = vmax.f32 %v1667_v2, %v1825_v13  ;;  %v638_v18 = vmax.f32 %v493_v8, %v535_v54  ;;  %v668_v1 = vsub.f32 1.0, %v636_v38  ;;  %v540_v31 = vsel %vm520_vm7, %v537_v60, %v539_v24 }
  0x64   :  { %v544_v55 = vrot.slane %v1673_v44, 2  ;;  %v639_v52 = vmax.f32 %v494_v14, %v538_v20  ;;  %v669_v42 = vsub.f32 1.0, %v637_v7  ;;  %v704_v46 = vsel %vm703_vm9, %v665_v21, 0.0 }
  0x65   :  { %v705_v33 = vsel %vm703_vm9, %v666_v43, 0.0  ;;  %v707_v29 = vsel %vm703_vm9, %v667_v23, 0.0  ;;  %v543_v63 = vsel %vm520_vm7, %v541_v9, %v542_v39  ;;  %v546_v30 = vrot.slane %v1676_v45, 2 }
  0x66   :  { %v547_v2 = vrot.slane %v1679_v49, 2  ;;  %v706_v13 = vadd.f32 %v705_v33, %v704_v46  ;;  %v497_v47 = vmax.f32 %v1670_v0, %v1831_v28  ;;  %v640_v44 = vmax.f32 %v495_v62, %v540_v31 }
  0x67   :  { %v670_v60 = vsub.f32 1.0, %v638_v18  ;;  %v709_v16 = vsel %vm703_vm9, %v668_v1, 0.0  ;;  %v1948_v27 = vsel %vm375_vm2, %v441_v6, %v442_v35  ;;  %v545_v58 = vsel %vm520_vm7, %v542_v39, %v544_v55  ;;  %v2322_v55 = vld [vmem:[#allocation10_spill] sm:$0xff] }
  0x68   :  { %v549_v8 = vrot.slane %v1682_v53, 2  ;;  %v708_v38 = vadd.f32 %v707_v29, %v706_v13  ;;  %v498_v14 = vmax.f32 %v1676_v45, %v1834_v37  ;;  %v641_v54 = vmax.f32 %v496_v3, %v543_v63  ;;  %v2323_v63 = vld [vmem:[#allocation26_spill] sm:$0xff] }
  0x69   :  { %v671_v20 = vsub.f32 1.0, %v639_v52  ;;  %v711_v0 = vsel %vm703_vm9, %v669_v42, 0.0  ;;  %v548_v28 = vsel %vm520_vm7, %v546_v30, %v547_v2  ;;  %v551_v24 = vrot.slane %v1685_v57, 2  ;;  %v2324_v30 = vld [vmem:[#allocation11_spill] sm:$0xff] }
  0x6a   :  { %v552_v7 = vrot.slane %v1688_v61, 2  ;;  %v710_v6 = vadd.f32 %v709_v16, %v708_v38  ;;  %v499_v21 = vmax.f32 %v1679_v49, %v1837_v50  ;;  %v642_v43 = vmax.f32 %v497_v47, %v545_v58  ;;  %v2321_v50 = vld [vmem:[#allocation9_spill] sm:$0xff] }
  0x6b   :  { %v672_v53 = vsub.f32 1.0, %v640_v44  ;;  %v713_v23 = vsel %vm703_vm9, %v670_v60, 0.0  ;;  %v447_v45 = vrot.slane %v1769_v19, 1  ;;  %v550_v37 = vsel %vm520_vm7, %v547_v2, %v549_v8 }
  0x6c   :  { %v554_v9 = vrot.slane %v1691_v48, 2  ;;  %v712_v39 = vadd.f32 %v711_v0, %v710_v6  ;;  %v500_v62 = vmax.f32 %v1685_v57, %v1840_v59  ;;  %v643_v3 = vmax.f32 %v498_v14, %v548_v28  ;;  %v2325_v0 = vld [vmem:[#allocation27_spill] sm:$0xff] }
  0x6d   :  { %v673_v18 = vsub.f32 1.0, %v641_v54  ;;  %v715_v1 = vsel %vm703_vm9, %v671_v20, 0.0  ;;  %v553_v49 = vsel %vm520_vm7, %v551_v24, %v552_v7  ;;  %v556_v31 = vrot.slane %v2321_v50, 2  ;;  %v2326_v24 = vld [vmem:[#allocation12_spill] sm:$0xff] }
  0x6e   :  { %v557_v52 = vrot.slane %v2322_v55, 2  ;;  %v714_v42 = vadd.f32 %v713_v23, %v712_v39  ;;  %v501_v46 = vmax.f32 %v1688_v61, %v1843_v11  ;;  %v644_v33 = vmax.f32 %v499_v21, %v550_v37 }
  0x6f   :  { %v674_v48 = vsub.f32 1.0, %v642_v43  ;;  %v717_v29 = vsel %vm703_vm9, %v672_v53, 0.0  ;;  %v449_v57 = vrot.slane %v2323_v63, 1  ;;  %v555_v59 = vsel %vm520_vm7, %v552_v7, %v554_v9  ;;  %v2327_v9 = vld [vmem:[#allocation13_spill] sm:$0xff] }
  0x70   :  { %v559_v2 = vrot.slane %v2324_v30, 2  ;;  %v716_v13 = vadd.f32 %v715_v1, %v714_v42  ;;  %v502_v47 = vmax.f32 %v2321_v50, %v1846_v40  ;;  %v645_v44 = vmax.f32 %v500_v62, %v553_v49  ;;  %v2328_v50 = vld [vmem:[#allocation14_spill] sm:$0xff] }
  0x71   :  { %v675_v60 = vsub.f32 1.0, %v643_v3  ;;  %v719_v16 = vsel %vm703_vm9, %v673_v18, 0.0  ;;  %v558_v61 = vsel %vm520_vm7, %v556_v31, %v557_v52  ;;  %v561_v11 = vrot.slane %v1703_v32, 2 }
  0x72   :  { %v562_v58 = vrot.slane %v1706_v36, 2  ;;  %v718_v8 = vadd.f32 %v717_v29, %v716_v13  ;;  %v503_v38 = vmax.f32 %v2322_v55, %v1849_v5  ;;  %v646_v14 = vmax.f32 %v501_v46, %v555_v59  ;;  %v2331_v59 = vld [vmem:[#allocation16_spill] sm:$0xff] }
  0x73   :  { %v676_v54 = vsub.f32 1.0, %v644_v33  ;;  %v721_v20 = vsel %vm703_vm9, %v674_v48, 0.0  ;;  %v451_v40 = vrot.slane %v2325_v0, 1  ;;  %v560_v28 = vsel %vm520_vm7, %v557_v52, %v559_v2  ;;  %v2329_v52 = vld [vmem:[#allocation30_spill] sm:$0xff]  ;;  %v2330_v48 = vld [vmem:[#allocation15_spill] sm:$0xff] }
  0x74   :  { %v564_v7 = vrot.slane %v2326_v24, 2  ;;  %v720_v6 = vadd.f32 %v719_v16, %v718_v8  ;;  %v504_v21 = vmax.f32 %v1703_v32, %v1853_v22  ;;  %v647_v43 = vmax.f32 %v502_v47, %v558_v61  ;;  %v2334_v61 = vld [vmem:[#allocation17_spill] sm:$0xff]  ;;  %v2335_v8 = vld [vmem:[#allocation32_spill] sm:$0xff]  ;;  %v2336_v24 = vld [vmem:[#allocation18_spill] sm:$0xff] }
  0x75   :  { %v677_v53 = vsub.f32 1.0, %v645_v44  ;;  %v723_v23 = vsel %vm703_vm9, %v675_v60, 0.0  ;;  %v563_v5 = vsel %vm520_vm7, %v561_v11, %v562_v58  ;;  %v566_v37 = vrot.slane %v1712_v4, 2  ;;  %v2333_v60 = vld [vmem:[#allocation28_spill] sm:$0xff] }
  0x76   :  { %v567_v39 = vrot.slane %v2327_v9, 2  ;;  %v722_v62 = vadd.f32 %v721_v20, %v720_v6  ;;  %v505_v3 = vmax.f32 %v1706_v36, %v1859_v26  ;;  %v648_v18 = vmax.f32 %v503_v38, %v560_v28  ;;  %v2337_v6 = vld [vmem:[#allocation19_spill] sm:$0xff] }
  0x77   :  { %v678_v1 = vsub.f32 1.0, %v646_v14  ;;  %v725_v49 = vsel %vm703_vm9, %v676_v54, 0.0  ;;  %v2002_v32 = vsel %vm375_vm2, %v442_v35, %v444_v12  ;;  %v565_v22 = vsel %vm520_vm7, %v562_v58, %v564_v7  ;;  %v2332_v12 = vld [vmem:[#allocation31_spill] sm:$0xff] }
  0x78   :  { %v569_v31 = vrot.slane %v2328_v50, 2  ;;  %v724_v55 = vadd.f32 %v723_v23, %v722_v62  ;;  %v506_v42 = vmax.f32 %v1712_v4, %v2329_v52  ;;  %v649_v36 = vmax.f32 %v504_v21, %v563_v5 }
  0x79   :  { %v679_v26 = vsub.f32 1.0, %v647_v43  ;;  %v727_v46 = vsel %vm703_vm9, %v677_v53, 0.0  ;;  %v568_v33 = vsel %vm520_vm7, %v566_v37, %v567_v39  ;;  %v571_v29 = vrot.slane %v2330_v48, 2  ;;  %v2338_v53 = vld [vmem:[#allocation33_spill] sm:$0xff] }
  0x7a   :  { %v572_v30 = vrot.slane %v2331_v59, 2  ;;  %v726_v35 = vadd.f32 %v725_v49, %v724_v55  ;;  %v507_v2 = vmax.f32 %v2327_v9, %v2332_v12  ;;  %v650_v13 = vmax.f32 %v505_v3, %v565_v22  ;;  %v2341_v22 = vld [vmem:[#allocation34_spill] sm:$0xff] }
  0x7b   :  { %v680_v47 = vsub.f32 1.0, %v648_v18  ;;  %v729_v44 = vsel %vm703_vm9, %v678_v1, 0.0  ;;  %v452_v4 = vrot.slane %v2333_v60, 1  ;;  %v570_v16 = vsel %vm520_vm7, %v567_v39, %v569_v31  ;;  %v2339_v39 = vld [vmem:[#allocation29_spill] sm:$0xff]  ;;  %v2340_v18 = vld [vmem:[#allocation20_spill] sm:$0xff] }
  0x7c   :  { %v574_v11 = vrot.slane %v2334_v61, 2  ;;  %v728_v58 = vadd.f32 %v727_v46, %v726_v35  ;;  %v508_v38 = vmax.f32 %v2330_v48, %v2335_v8  ;;  %v651_v14 = vmax.f32 %v506_v42, %v568_v33  ;;  %v2343_v46 = vld [vmem:[#allocation22_spill] sm:$0xff] }
  0x7d   :  { %v681_v54 = vsub.f32 1.0, %v649_v36  ;;  %v731_v20 = vsel %vm703_vm9, %v679_v26, 0.0  ;;  %v573_v28 = vsel %vm520_vm7, %v571_v29, %v572_v30  ;;  %v576_v7 = vrot.slane %v2336_v24, 2  ;;  %v2342_v36 = vld [vmem:[#allocation21_spill] sm:$0xff] }
  0x7e   :  { %v577_v21 = vrot.slane %v2337_v6, 2  ;;  %v730_v43 = vadd.f32 %v729_v44, %v728_v58  ;;  %v509_v23 = vmax.f32 %v2331_v59, %v2338_v53  ;;  %v652_v5 = vmax.f32 %v507_v2, %v570_v16 }
  0x7f   :  { %v682_v37 = vsub.f32 1.0, %v650_v13  ;;  %v733_v9 = vsel %vm703_vm9, %v680_v47, 0.0  ;;  %v454_v62 = vrot.slane %v2339_v39, 1  ;;  %v575_v3 = vsel %vm520_vm7, %v572_v30, %v574_v11  ;;  %v2344_v13 = vld [vmem:[#allocation23_spill] sm:$0xff] }
  0x80   :  { %v579_v1 = vrot.slane %v2340_v18, 2  ;;  %v732_v49 = vadd.f32 %v731_v20, %v730_v43  ;;  %v510_v50 = vmax.f32 %v2336_v24, %v2341_v22  ;;  %v653_v31 = vmax.f32 %v508_v38, %v573_v28 }
  0x81   :  { %v683_v55 = vsub.f32 1.0, %v651_v14  ;;  %v735_v52 = vsel %vm703_vm9, %v681_v54, 0.0  ;;  %v578_v42 = vsel %vm520_vm7, %v576_v7, %v577_v21  ;;  %v581_v26 = vrot.slane %v2342_v36, 2 }
  0x82   :  { %v582_v33 = vrot.slane %v2343_v46, 2  ;;  %v734_v48 = vadd.f32 %v733_v9, %v732_v49  ;;  %v511_v29 = vmax.f32 %v2337_v6, %v1908_v41  ;;  %v654_v59 = vmax.f32 %v509_v23, %v575_v3 }
  0x83   :  { %v684_v30 = vsub.f32 1.0, %v652_v5  ;;  %v737_v35 = vsel %vm703_vm9, %v682_v37, 0.0  ;;  %v448_v12 = vsel %vm375_vm2, %v446_v25, %v447_v45  ;;  %v580_v2 = vsel %vm520_vm7, %v577_v21, %v579_v1 }
  0x84   :  { %v584_v47 = vrot.slane %v2344_v13, 2  ;;  %v736_v44 = vadd.f32 %v735_v52, %v734_v48  ;;  %v512_v16 = vmax.f32 %v2342_v36, %v1914_v56  ;;  %v655_v61 = vmax.f32 %v510_v50, %v578_v42 }
  0x85   :  { %v685_v41 = vsub.f32 1.0, %v653_v31  ;;  %v739_v11 = vsel %vm703_vm9, %v683_v55, 0.0  ;;  %v583_v58 = vsel %vm520_vm7, %v581_v26, %v582_v33  ;;  %v586_v8 = vrot.slane %v2319_v10, 2 }
  0x86   :  { %v587_v38 = vrot.slane %v2320_v51, 2  ;;  %v738_v14 = vadd.f32 %v737_v35, %v736_v44  ;;  %v513_v25 = vmax.f32 %v2343_v46, %v1917_v34  ;;  %v656_v54 = vmax.f32 %v511_v29, %v580_v2 }
  0x87   :  { %v686_v20 = vsub.f32 1.0, %v654_v59  ;;  %v741_v28 = vsel %vm703_vm9, %v684_v30, 0.0  ;;  %v450_v56 = vsel %vm375_vm2, %v447_v45, %v449_v57  ;;  %v585_v24 = vsel %vm520_vm7, %v582_v33, %v584_v47 }
  0x88   :  { %v589_v7 = vrot.slane %v1763_v15, 2  ;;  %v740_v6 = vadd.f32 %v739_v11, %v738_v14  ;;  %v514_v21 = vmax.f32 %v2319_v10, %v1948_v27  ;;  %v657_v43 = vmax.f32 %v512_v16, %v583_v58 }
  0x89   :  { %v687_v34 = vsub.f32 1.0, %v655_v61  ;;  %v743_v53 = vsel %vm703_vm9, %v685_v41, 0.0  ;;  %v588_v23 = vsel %vm520_vm7, %v586_v8, %v587_v38  ;;  %v591_v5 = vrot.slane %v1766_v17, 2 }
  0x8a   :  { %v592_v37 = vrot.slane %v1769_v19, 2  ;;  %v742_v9 = vadd.f32 %v741_v28, %v740_v6  ;;  %v515_v45 = vmax.f32 %v2320_v51, %v2002_v32  ;;  %v658_v57 = vmax.f32 %v513_v25, %v585_v24 }
  0x8b   :  { %v688_v15 = vsub.f32 1.0, %v656_v54  ;;  %v745_v3 = vsel %vm703_vm9, %v686_v20, 0.0  ;;  %v453_v10 = vsel %vm375_vm2, %v451_v40, %v452_v4  ;;  %v590_v27 = vsel %vm520_vm7, %v587_v38, %v589_v7 }
  0x8c   :  { %v594_v18 = vrot.slane %v2323_v63, 2  ;;  %v744_v1 = vadd.f32 %v743_v53, %v742_v9  ;;  %v516_v49 = vmax.f32 %v1766_v17, %v448_v12  ;;  %v659_v22 = vmax.f32 %v514_v21, %v588_v23 }
  0x8d   :  { %v689_v50 = vsub.f32 1.0, %v657_v43  ;;  %v747_v51 = vsel %vm703_vm9, %v687_v34, 0.0  ;;  %v593_v32 = vsel %vm520_vm7, %v591_v5, %v592_v37  ;;  %v596_v31 = vrot.slane %v2325_v0, 2 }
  0x8e   :  { %v597_v55 = vrot.slane %v2333_v60, 2  ;;  %v746_v52 = vadd.f32 %v745_v3, %v744_v1  ;;  %v517_v40 = vmax.f32 %v1769_v19, %v450_v56  ;;  %v660_v42 = vmax.f32 %v515_v45, %v590_v27 }
  0x8f   :  { %v690_v36 = vsub.f32 1.0, %v658_v57  ;;  %v749_v63 = vsel %vm703_vm9, %v688_v15, 0.0  ;;  %v455_v17 = vsel %vm375_vm2, %v452_v4, %v454_v62  ;;  %v595_v26 = vsel %vm520_vm7, %v592_v37, %v594_v18  ;;  %v702_v37 = vld [vmem:[#allocation3] sm:$0x1] }
  0x90   :  { %v599_v46 = vrot.slane %v2339_v39, 2  ;;  %v748_v33 = vadd.f32 %v747_v51, %v746_v52  ;;  %v518_v48 = vmax.f32 %v2325_v0, %v453_v10  ;;  %v661_v29 = vmax.f32 %v516_v49, %v593_v32 }
  0x91   :  { %v691_v59 = vsub.f32 1.0, %v659_v22  ;;  %v751_v19 = vsel %vm703_vm9, %v689_v50, 0.0  ;;  %v598_v30 = vsel %vm520_vm7, %v596_v31, %v597_v55  ;;  %v519_v12 = vmax.f32 %v2333_v60, %v455_v17 }
  0x92   :  { %v750_v35 = vadd.f32 %v749_v63, %v748_v33  ;;  %v662_v2 = vmax.f32 %v517_v40, %v595_v26  ;;  %v692_v13 = vsub.f32 1.0, %v660_v42  ;;  %v753_v4 = vsel %vm703_vm9, %v690_v36, 0.0 }
  0x93   :  { %v600_v62 = vsel %vm520_vm7, %v597_v55, %v599_v46  ;;  %v663_v39 = vmax.f32 %v518_v48, %v598_v30  ;;  %v693_v44 = vsub.f32 1.0, %v661_v29  ;;  %v755_v0 = vsel %vm703_vm9, %v691_v59, 0.0 }
  0x94   :  { %v752_v47 = vadd.f32 %v751_v19, %v750_v35  ;;  %v664_v61 = vmax.f32 %v519_v12, %v600_v62  ;;  %v694_v41 = vsub.f32 1.0, %v662_v2  ;;  %v757_v11 = vsel %vm703_vm9, %v692_v13, 0.0 }
  0x95   :  { %v695_v8 = vsub.f32 1.0, %v663_v39  ;;  %v759_v60 = vsel %vm703_vm9, %v693_v44, 0.0 }
  0x96   :  { %v754_v16 = vadd.f32 %v753_v4, %v752_v47  ;;  %v696_v14 = vsub.f32 1.0, %v664_v61  ;;  %v761_v25 = vsel %vm703_vm9, %v694_v41, 0.0 }
  0x97   :  { %v763_v20 = vsel %vm703_vm9, %v695_v8, 0.0 }
  0x98   :  { %v756_v58 = vadd.f32 %v755_v0, %v754_v16  ;;  %v765_v56 = vsel %vm703_vm9, %v696_v14, 0.0 }
  0x9a   :  { %v758_v38 = vadd.f32 %v757_v11, %v756_v58 }
  0x9c   :  { %v760_v54 = vadd.f32 %v759_v60, %v758_v38 }
  0x9e   :  { %v762_v28 = vadd.f32 %v761_v25, %v760_v54 }
  0xa0   :  { %v764_v24 = vadd.f32 %v763_v20, %v762_v28 }
  0xa2   :  { %v766_v7 = vadd.f32 %v765_v56, %v764_v24 }
  0xa4   :  { %767 = vadd.xlane.f32.xlu0 %v766_v7 }
 0x117   :  { %v768_v6 = vpop.xlane.xlu0 %767 }
 0x118   :  { %v769_v21 = vrot.slane %v768_v6, 4 }
 0x11a   :  { %v770_v43 = vadd.f32 %v769_v21, %v768_v6 }
 0x11c   :  { %v771_v34 = vrot.slane %v770_v43, 2 }
 0x11e   :  { %v772_v53 = vadd.f32 %v771_v34, %v770_v43 }
 0x120   :  { %v773_v23 = vrot.slane %v772_v53, 1 }
 0x122   :  { %v774_v5 = vadd.f32 %v773_v23, %v772_v53 }
 0x124   :  { %849 = vpush %v774_v5 }
 0x155   :  { %s850_s7 = spop %849 }
 0x156   :  { %v776_v9 = vstv %s850_s7 }
 0x157   :  { %v777_v45 = vadd.f32 %v776_v9, %v702_v37 }
 0x159   :  { %778 = vst [vmem:[#allocation3] sm:$0x1] %v777_v45 }
 0x15a   :  { %789 = dma.vmem_to_hbm [thread:$0]  %s785_s3, 16, %s787_s6, [#allocation4]  }
 0x15b   :  { %877 = dma.done.wait [#allocation4], 16  }
 0x15c   :  { %878 = vsyncadd [#allocation4], 4294967280 }
 0x15d   :  { %794 = vsyncpa [#allocation4], 1 }

</bundles_post_ra>
